<compile_context>
chip_gen: v6e
topology: v6e:2x2x1
jax: 0.10.0
libtpu: 0.0.40
codegen_flags: <defaults>
</compile_context>

<pallas_src>
import functools

import jax
import jax.numpy as jnp
from jax.experimental import pallas as pl
from jax.experimental.pallas import tpu as pltpu


def _projection_kernel(x_ref, w_ref, b_ref, o_ref):
    """One (tm, tn) output tile: a single MXU pass over the full K, plus bias."""
    acc = jnp.dot(x_ref[...], w_ref[...], preferred_element_type=jnp.float32)
    o_ref[...] = (acc + b_ref[...].astype(jnp.float32)).astype(o_ref.dtype)


@functools.partial(jax.jit, static_argnames=("tm", "tn", "out_dtype"))
def projection_forward(x, w_t, b, *, tm=512, tn=2048, out_dtype=None):
    """Linear projection: x (..., d_model) @ w_t (d_model, vocab) + b (vocab,).

    Weight is stored pre-transposed as (d_model, vocab_size) and is used in
    whatever dtype it already has (pre-cast it to bf16 at init for the fast
    path).  Accumulation is always f32 on the MXU.
    """
    *lead, K = x.shape
    Kw, N = w_t.shape
    if Kw != K:
        raise ValueError(f"d_model mismatch: x has {K}, weight has {Kw}")

    M = 1
    for s in lead:
        M *= s

    out_dtype = x.dtype if out_dtype is None else jnp.dtype(out_dtype)

    # Compute dtype follows the (pre-cast) weight; only activations are cast.
    compute_dtype = w_t.dtype
    x2d = x.reshape(M, K).astype(compute_dtype)
    b2d = b.reshape(1, N)

    # Shrink tiles for small problems while keeping (8, 128) block alignment.
    # (block_shape last two dims must be 8/128-multiples or equal the full dim;
    #  ragged final grid blocks are handled by Pallas masking.)
    tm = M if M < 8 else min(tm, (M // 8) * 8)
    tn = N if N < 128 else min(tn, (N // 128) * 128)

    # N outer, M inner: the (K, tn) weight tile index is constant across the
    # inner M axis, so the big K*N operand is DMA'd from HBM once per column.
    grid = (pl.cdiv(N, tn), pl.cdiv(M, tm))

    # Explicit VMEM limit derived from the actual double-buffered footprint so
    # larger tiles work on v5e (16 MiB scoped default) and stay honest on v7x
    # (64 MiB physical).
    in_b = jnp.dtype(compute_dtype).itemsize
    out_b = jnp.dtype(out_dtype).itemsize
    bias_b = jnp.dtype(b2d.dtype).itemsize
    vmem_bytes = 2 * (tm * K * in_b + K * tn * in_b + tn * bias_b + tm * tn * out_b)
    vmem_limit = int(max(vmem_bytes + (8 << 20), 32 << 20))

    out2d = pl.pallas_call(
        _projection_kernel,
        out_shape=jax.ShapeDtypeStruct((M, N), out_dtype),
        grid_spec=pltpu.PrefetchScalarGridSpec(
            num_scalar_prefetch=0,
            grid=grid,
            in_specs=[
                pl.BlockSpec((tm, K), lambda j, i: (i, 0)),   # x tile (streams over M)
                pl.BlockSpec((K, tn), lambda j, i: (0, j)),   # W^T tile (resident per j)
                pl.BlockSpec((1, tn), lambda j, i: (0, j)),   # bias tile
            ],
            out_specs=pl.BlockSpec((tm, tn), lambda j, i: (i, j)),
        ),
        compiler_params=pltpu.CompilerParams(
            dimension_semantics=("parallel", "parallel"),
            vmem_limit_bytes=vmem_limit,
        ),
    )(x2d, w_t, b2d)

    return out2d.reshape(*lead, N)


def init_projection_params(key, d_model, vocab_size, *,
                           param_dtype=jnp.float32, weight_dtype=None):
    """Init matching nn.Linear's U(-1/sqrt(d_model), 1/sqrt(d_model)).

    Weight is returned pre-transposed (d_model, vocab_size) and, if
    weight_dtype is given (e.g. bf16), pre-cast once here so the forward pass
    never re-converts it.  Bias stays in param_dtype (f32 by default).
    """
    kw, kb = jax.random.split(key)
    bound = 1.0 / (d_model ** 0.5)
    w_t = jax.random.uniform(kw, (d_model, vocab_size), param_dtype, -bound, bound)
    b = jax.random.uniform(kb, (vocab_size,), param_dtype, -bound, bound)
    if weight_dtype is not None:
        w_t = w_t.astype(weight_dtype)
    return w_t, b


if __name__ == "__main__":
    batch, seq, d_model, vocab_size = 2, 8, 32, 64

    key = jax.random.PRNGKey(0)
    kx, kp = jax.random.split(key)

    x = jax.random.normal(kx, (batch, seq, d_model), dtype=jnp.float32)
    w_t, b = init_projection_params(kp, d_model, vocab_size)  # f32 reference params

    ref = x @ w_t + b

    # Production path: weight pre-cast to bf16 once (outside the hot path),
    # bf16 MXU compute with f32 accumulation.
    w_bf16 = w_t.astype(jnp.bfloat16)
    out_bf16 = jax.block_until_ready(projection_forward(x, w_bf16, b))
    assert out_bf16.shape == (batch, seq, vocab_size)
    assert out_bf16.dtype == x.dtype
    assert jnp.allclose(out_bf16, ref, atol=5e-2, rtol=5e-2)

    # Full-precision path (f32 weight) for a tight numerical check.
    out_f32 = jax.block_until_ready(projection_forward(x, w_t, b))
    assert out_f32.shape == (batch, seq, vocab_size)
    assert jnp.allclose(out_f32, ref, atol=1e-5, rtol=1e-5)

    # Optional bf16 logits output (halves the dominant M x N write stream).
    out_bf16_logits = jax.block_until_ready(
        projection_forward(x, w_bf16, b, out_dtype=jnp.bfloat16)
    )
    assert out_bf16_logits.dtype == jnp.bfloat16
    assert jnp.allclose(out_bf16_logits.astype(jnp.float32), ref, atol=1e-1, rtol=1e-1)

    print("KERNEL_OK")
</pallas_src>

<mosaic_0001>
module attributes {stable_mosaic.version = 11 : i64} {
  func.func @_projection_kernel(%arg0: i32, %arg1: i32, %arg2: memref<16x32xbf16, #tpu.memory_space<vmem>>, %arg3: memref<32x64xbf16, #tpu.memory_space<vmem>>, %arg4: memref<1x64xf32, #tpu.memory_space<vmem>>, %arg5: memref<16x64xf32, #tpu.memory_space<vmem>>) attributes {dimension_semantics = [#tpu.dimension_semantics<parallel>, #tpu.dimension_semantics<parallel>], iteration_bounds = array<i64: 1, 1>, scalar_prefetch = 0 : i64, scratch_operands = 0 : i64, tpu.core_type = #tpu.core_type<tc>, window_params = [{transform_indices = @transform_0, window_bounds = array<i64: 16, 32>}, {transform_indices = @transform_1, window_bounds = array<i64: 32, 64>}, {transform_indices = @transform_2, window_bounds = array<i64: 1, 64>}, {transform_indices = @transform_3, window_bounds = array<i64: 16, 64>}]} {
    %c0 = arith.constant 0 : index
    %c0_0 = arith.constant 0 : index
    %0 = vector.load %arg2[%c0, %c0_0] : memref<16x32xbf16, #tpu.memory_space<vmem>>, vector<16x32xbf16>
    %c0_1 = arith.constant 0 : index
    %c0_2 = arith.constant 0 : index
    %1 = vector.load %arg3[%c0_1, %c0_2] : memref<32x64xbf16, #tpu.memory_space<vmem>>, vector<32x64xbf16>
    %cst = arith.constant dense<0.000000e+00> : vector<16x64xf32>
    %2 = tpu.matmul %0, %1, %cst {dimension_numbers = #tpu.dot_dimension_numbers<[1], [0], [0], [1], [0, 0, 1, 1], [], []>} : vector<16x32xbf16>, vector<32x64xbf16>, vector<16x64xf32> -> vector<16x64xf32>
    %c0_3 = arith.constant 0 : index
    %c0_4 = arith.constant 0 : index
    %3 = vector.load %arg4[%c0_3, %c0_4] : memref<1x64xf32, #tpu.memory_space<vmem>>, vector<1x64xf32>
    %4 = vector.broadcast %3 : vector<1x64xf32> to vector<16x64xf32>
    %5 = arith.addf %2, %4 : vector<16x64xf32>
    %c0_5 = arith.constant 0 : index
    %c0_6 = arith.constant 0 : index
    %6 = vector.load %arg5[%c0_5, %c0_6] : memref<16x64xf32, #tpu.memory_space<vmem>>, vector<16x64xf32>
    tpu.vector_store %arg5[%c0_5, %c0_6], %5 {strides = array<i32>} : memref<16x64xf32, #tpu.memory_space<vmem>>, vector<16x64xf32>,
    return
  }
  func.func @transform_0(%arg0: i32, %arg1: i32) -> (i32, i32) {
    %c0_i32 = arith.constant 0 : i32
    %c0_i32_0 = arith.constant 0 : i32
    return %arg1, %c0_i32 : i32, i32
  }
  func.func @transform_1(%arg0: i32, %arg1: i32) -> (i32, i32) {
    %c0_i32 = arith.constant 0 : i32
    %c0_i32_0 = arith.constant 0 : i32
    return %c0_i32, %arg0 : i32, i32
  }
  func.func @transform_2(%arg0: i32, %arg1: i32) -> (i32, i32) {
    %c0_i32 = arith.constant 0 : i32
    %c0_i32_0 = arith.constant 0 : i32
    return %c0_i32, %arg0 : i32, i32
  }
  func.func @transform_3(%arg0: i32, %arg1: i32) -> (i32, i32) {
    %c0_i32 = arith.constant 0 : i32
    return %arg1, %arg0 : i32, i32
  }
}

</mosaic_0001>

<bundles_post_ra>
// kernel: projection_forward.1
= control target key start
LH: loop header
LB: loop body
LE: loop exit
PB: predicated region body
PF: predicated region fallthrough
CT: control target
= control target key end

     0   :  { %v156_v1 = vmov 0.0   ;;  %vm157_vm0 = vmmov 0   ;;  %s196_s0 = inlined_call_operand.vmem [shape: bf16[16,32], index: 0, kind: input, shape index: {}]   ;;  %s197_s1 = inlined_call_operand.vmem [shape: bf16[32,64], index: 1, kind: input, shape index: {}]   ;;  %s198_s2 = inlined_call_operand.vmem [shape: f32[1,64], index: 2, kind: input, shape index: {}]   ;;  %s199_s3 = inlined_call_operand.hbm [shape: f32[16,64], index: 3, kind: output, shape index: {}]  }
   0x1   :  { %v131_v0 = vld [vmem:[%s197_s1 + $0x8] sm:$0xff]   ;;  %118 = vmatprep.subr.bf16.mxu0 %v156_v1  ;;  %v132_v2 = vld [vmem:[%s197_s1] sm:$0xff]   ;;  %122 = vmatprep.mubr.msk.bf16.mxu0 %vm157_vm0, %v156_v1 }
   0x2   :  { %119 = vmatpush3.bf16.msra.mxu0 %v131_v0 }
   0x3   :  { %120 = vmatprep.subr.bf16.mxu0 %v156_v1 }
   0x4   :  { %8 = vsyncpa [#allocation3], 0  ;;  %v133_v3 = vld [vmem:[%s196_s0] sm:$0xff]   ;;  %vm46_vm1 = vcmask 261120   ;;  %vm91_vm2 = vcmask 523264   ;;  %s158_s20 = smov [#allocation2]  }
   0x5   :  { %v110_v4 = vld [vmem:[%s198_s2] ss:$0 sm:$0xff]  ;;  %s99_s1 = sshll.u32 %s158_s20, 4  ;;  %s100_s1 = int_to_ptr.vmem [resolvable:$true] %s99_s1 }
   0x6   :  { %121 = vmatpush3.bf16.msra.mxu0 %v132_v2  ;;  %s134_s0 = scalar_lea.vmem %s100_s1, 256  ;;  %p139_p1 = scmp.lt.s32.totalorder %s100_s1, %s100_s1 }
   0x7   :  { %p135_p0 = scmp.ne.s32.totalorder %s100_s1, %s134_s0  ;;  %p140_p2 = scmp.lt.s32.totalorder %s134_s0, %s134_s0 }
   0x9   :  { %123 = vmatmul.mubr.msk.bf16.vlgmr.msra.gmra.mxu0 %vm46_vm1, %v133_v3  ;;  %p141_p3 = por %p140_p2, %p139_p1 }
   0xb   :  { %p142_p4 = pnand %p141_p3, %p135_p0 }
  0xc9   :  { %v84_v5 = vpop.f32.mrf.mxu0 }
  0xca   :  { %v85_v6 = vadd.f32 %v110_v4, %v84_v5 }
  0xcb   :  { %v124_v7 = vpop.f32.mrf.mxu0 }
  0xcc   :  { %92 = vst.msk [vmem:[#allocation2] sm:$0xff] %vm91_vm2, %v85_v6 }
  0xcd   :  { %v87_v8 = vpop.f32.mrf.mxu0 }
  0xce   :  { %v88_v9 = vadd.f32 %v110_v4, %v87_v8 }
  0xcf   :  { %v125_v10 = vpop.f32.mrf.mxu0 }
  0xd0   :  { %93 = vst.msk [vmem:[#allocation2 + $0x8] sm:$0xff] %vm91_vm2, %v88_v9 }
  0xd1   :  { %145 = shalt.err (!%p142_p4)
}
  0xd2   :  { %s159_s2 = smov 128   ;;  %s160_s21 = smov 8  }
  0xd3   :  { %105 = dma.vmem_to_hbm [thread:$0]  %s100_s1, 256, %s199_s3, [#allocation3], %s159_s2, %s159_s2, %s160_s21  }
  0xd4   :  { %154 = dma.done.wait [#allocation3], 256  }
  0xd5   :  { %155 = vsyncadd [#allocation3], 4294967040 }
  0xd6   :  { %109 = vsyncpa [#allocation3], 1 }

</bundles_post_ra>
